<compile_context>
chip_gen: v6e
topology: v6e:2x2x1
jax: 0.10.0
libtpu: 0.0.40
codegen_flags: <defaults>
</compile_context>

<pallas_src>
import functools

import jax
import jax.numpy as jnp
from jax import lax
from jax.experimental import pallas as pl
from jax.experimental.pallas import tpu as pltpu

_LANES = 128
_SUB_ROWS = 256            # strip-mine chunk: (256,128) f32 = 32 vregs / operand
_MAX_BLOCK_ROWS = 2048     # (2048,128) f32 tile = 1 MiB; 5 inputs x 2 bufs = 10 MiB


def _round_up(x, m):
    return ((x + m - 1) // m) * m


def _num_tensorcores():
    """Best effort: 2 TensorCores per chip on v7x, 1 on v5e/v6e."""
    try:
        kind = jax.devices()[0].device_kind.lower()
    except Exception:
        return 1
    return 2 if ("v7" in kind or "7x" in kind) else 1


def _comp_loss_kernel(inp_ref, tgt_ref, tri_ref, fg_ref, bg_ref,
                      num_ref, den_ref, *,
                      rows, block_rows, sub_rows, nb_half):
    c = pl.program_id(0)   # TensorCore ("parallel") axis
    i = pl.program_id(1)   # reduction ("arbitrary") axis

    @pl.when(i == 0)
    def _():
        num_ref[...] = jnp.zeros_like(num_ref)
        den_ref[...] = jnp.zeros_like(den_ref)

    blk = c * nb_half + i          # logical (unclamped) block index
    row0 = blk * block_rows
    n_sub = block_rows // sub_rows

    def accumulate(masked):
        def body(j, carry):
            num_acc, den_acc = carry
            r0 = j * sub_rows
            sl = pl.ds(r0, sub_rows)

            tri = tri_ref[sl, :].astype(jnp.float32)
            # torch.where(eq(ge(t,0.4), le(t,0.6)), 1, 0)  ==  (t>=0.4)&(t<=0.6)
            m = jnp.where((tri >= jnp.float32(0.4)) & (tri <= jnp.float32(0.6)),
                          jnp.float32(1.0), jnp.float32(0.0))

            inp = inp_ref[sl, :].astype(jnp.float32)
            tgt = tgt_ref[sl, :].astype(jnp.float32)
            fg = fg_ref[sl, :].astype(jnp.float32)
            bg = bg_ref[sl, :].astype(jnp.float32)

            # (inp*fg + (1-inp)*bg) - (tgt*fg + (1-tgt)*bg) == (inp-tgt)*(fg-bg)
            d = (inp - tgt) * (fg - bg)
            diff = jnp.sqrt(d * d + jnp.float32(1e-12))

            pn = diff * m
            pd = m
            if masked:
                # Tail / duplicate block only: select (not multiply) so stale
                # VMEM garbage (NaN/Inf, or trimap-looking values in [0.4,0.6])
                # past the logical end cannot leak into either sum.
                row_ids = (row0 + r0) + jax.lax.broadcasted_iota(
                    jnp.int32, (sub_rows, _LANES), 0)
                valid = row_ids < rows
                pn = jnp.where(valid, pn, jnp.float32(0.0))
                pd = jnp.where(valid, pd, jnp.float32(0.0))

            # Sublane-preserving partial sums: pure vreg adds, lane-dense.
            num_acc = num_acc + pn.reshape(sub_rows // 8, 8, _LANES).sum(axis=0)
            den_acc = den_acc + pd.reshape(sub_rows // 8, 8, _LANES).sum(axis=0)
            return num_acc, den_acc

        zero = jnp.zeros((8, _LANES), jnp.float32)
        num_acc, den_acc = lax.fori_loop(0, n_sub, body, (zero, zero),
                                         unroll=True)
        num_ref[...] += num_acc
        den_ref[...] += den_acc

    # Interior blocks: unmasked fast path. Tail block (and, with the 2-core
    # split and odd nb_total, the clamped duplicate block whose row0 >= rows)
    # takes the masked path.
    @pl.when(row0 + block_rows <= rows)
    def _():
        accumulate(masked=False)

    @pl.when(row0 + block_rows > rows)
    def _():
        accumulate(masked=True)


@jax.jit
def comp_loss(inp, tgt, trimap, fg, bg):
    n = inp.size

    if n % _LANES == 0:
        # Zero-copy: ravel/reshape of a contiguous array, no HBM round-trip.
        rows = n // _LANES

        def prep(x):
            return x.reshape(rows, _LANES)
    else:
        # Odd sizes only: pad the last partial lane-row with zeros
        # (trimap == 0 -> weight 0, so padding contributes nothing).
        rows = pl.cdiv(n, _LANES)

        def prep(x):
            flat = x.reshape(-1)
            flat = jnp.pad(flat, (0, rows * _LANES - n))
            return flat.reshape(rows, _LANES)

    # block_rows is always a multiple of _SUB_ROWS; partial-block padding is
    # masked in-kernel, so rounding up costs no extra HBM traffic.
    block_rows = min(_MAX_BLOCK_ROWS, _round_up(rows, _SUB_ROWS))
    nb_total = pl.cdiv(rows, block_rows)

    num_cores = _num_tensorcores()
    if num_cores == 1:
        # v5e / v6e: single TensorCore -> no duplicate block, no wasted DMA.
        nb_half = nb_total
        grid = (1, nb_total)
        in_idx = lambda c, i: (i, 0)
    else:
        # v7x: split the row range across the two TensorCores.
        nb_half = pl.cdiv(nb_total, 2)
        grid = (2, nb_half)
        if nb_total % 2 == 0:
            in_idx = lambda c, i: (c * nb_half + i, 0)
        else:
            # Second core may run one step past the end; clamp the DMA source
            # and let the in-kernel masked path zero its contribution.
            in_idx = lambda c, i: (jnp.minimum(c * nb_half + i, nb_total - 1), 0)

    tile_spec = pl.BlockSpec((block_rows, _LANES), in_idx)
    acc_spec = pl.BlockSpec((None, 8, _LANES), lambda c, i: (c, 0, 0))

    args = [prep(a) for a in (inp, tgt, trimap, fg, bg)]

    bytes_accessed = sum(int(a.size) * a.dtype.itemsize for a in args) \
        + 2 * num_cores * 8 * _LANES * 4
    cost = pl.CostEstimate(flops=12 * n, transcendentals=n,
                           bytes_accessed=bytes_accessed)

    kernel = functools.partial(_comp_loss_kernel, rows=rows,
                               block_rows=block_rows, sub_rows=_SUB_ROWS,
                               nb_half=nb_half)

    num, den = pl.pallas_call(
        kernel,
        out_shape=(jax.ShapeDtypeStruct((num_cores, 8, _LANES), jnp.float32),
                   jax.ShapeDtypeStruct((num_cores, 8, _LANES), jnp.float32)),
        grid_spec=pltpu.PrefetchScalarGridSpec(
            num_scalar_prefetch=0,
            grid=grid,
            in_specs=[tile_spec] * 5,
            out_specs=(acc_spec, acc_spec),
        ),
        compiler_params=pltpu.CompilerParams(
            dimension_semantics=("parallel", "arbitrary"),
            # 10 MiB of double-buffered inputs at 2048 rows; 32 MiB leaves
            # ample headroom even on v7x's 64 MiB physical VMEM.
            vmem_limit_bytes=32 * 1024 * 1024),
        cost_estimate=cost,
    )(*args)

    # Final cross-lane reduction + division (tiny) in plain JAX.
    # Note: division by zero when no trimap value lies in [0.4, 0.6] is
    # inherited from the PyTorch reference (sum(w) == 0).
    return (jnp.sum(num) / jnp.sum(den)).astype(jnp.float32)


def _reference(inp, tgt, trimap, fg, bg):
    w = jnp.where((trimap >= 0.4) == (trimap <= 0.6), 1.0, 0.0)
    comp_t = tgt * fg + (1.0 - tgt) * bg
    comp_i = inp * fg + (1.0 - inp) * bg
    diff = jnp.sqrt((comp_i - comp_t) ** 2 + 1e-12)
    return jnp.sum(diff * w) / jnp.sum(w)


if __name__ == "__main__":
    key = jax.random.PRNGKey(0)
    k1, k2, k3, k4, k5 = jax.random.split(key, 5)
    B, C, H, W = 2, 3, 16, 16  # NCHW, all five tensors share this shape
    inp = jax.random.uniform(k1, (B, C, H, W), jnp.float32)     # predicted alpha
    tgt = jax.random.uniform(k2, (B, C, H, W), jnp.float32)     # ground-truth alpha
    trimap = jax.random.uniform(k3, (B, C, H, W), jnp.float32)  # trimap in [0, 1]
    fg = jax.random.uniform(k4, (B, C, H, W), jnp.float32)      # foreground RGB
    bg = jax.random.uniform(k5, (B, C, H, W), jnp.float32)      # background RGB

    out = comp_loss(inp, tgt, trimap, fg, bg)
    jax.block_until_ready(out)

    ref = _reference(inp, tgt, trimap, fg, bg)
    assert jnp.allclose(out, ref, rtol=1e-4, atol=1e-5), (out, ref)
    print("KERNEL_OK")
</pallas_src>

<mosaic_0001>
module attributes {stable_mosaic.version = 11 : i64} {
  func.func @_comp_loss_kernel(%arg0: i32, %arg1: i32, %arg2: memref<256x128xf32, #tpu.memory_space<vmem>>, %arg3: memref<256x128xf32, #tpu.memory_space<vmem>>, %arg4: memref<256x128xf32, #tpu.memory_space<vmem>>, %arg5: memref<256x128xf32, #tpu.memory_space<vmem>>, %arg6: memref<256x128xf32, #tpu.memory_space<vmem>>, %arg7: memref<1x8x128xf32, #tpu.memory_space<vmem>>, %arg8: memref<1x8x128xf32, #tpu.memory_space<vmem>>) attributes {dimension_semantics = [#tpu.dimension_semantics<parallel>, #tpu.dimension_semantics<arbitrary>], iteration_bounds = array<i64: 1, 1>, scalar_prefetch = 0 : i64, scratch_operands = 0 : i64, tpu.core_type = #tpu.core_type<tc>, window_params = [{transform_indices = @transform_0, window_bounds = array<i64: 256, 128>}, {transform_indices = @transform_1, window_bounds = array<i64: 256, 128>}, {transform_indices = @transform_2, window_bounds = array<i64: 256, 128>}, {transform_indices = @transform_3, window_bounds = array<i64: 256, 128>}, {transform_indices = @transform_4, window_bounds = array<i64: 256, 128>}, {transform_indices = @transform_5, window_bounds = array<i64: 1, 8, 128>}, {transform_indices = @transform_6, window_bounds = array<i64: 1, 8, 128>}]} {
    %c0_i32 = arith.constant 0 : i32
    %0 = arith.cmpi eq, %arg1, %c0_i32 : i32
    %1 = arith.extui %0 : i1 to i32
    %c0_i32_0 = arith.constant 0 : i32
    %2 = arith.cmpi ne, %1, %c0_i32_0 : i32
    scf.if %2 {
      %cst = arith.constant 0.000000e+00 : f32
      %14 = vector.broadcast %cst : f32 to vector<8x128xf32>
      %c0 = arith.constant 0 : index
      %c0_6 = arith.constant 0 : index
      %c0_7 = arith.constant 0 : index
      %15 = vector.load %arg7[%c0, %c0_6, %c0_7] : memref<1x8x128xf32, #tpu.memory_space<vmem>>, vector<1x8x128xf32>
      %16 = vector.shape_cast %15 : vector<1x8x128xf32> to vector<8x128xf32>
      %17 = vector.shape_cast %14 : vector<8x128xf32> to vector<1x8x128xf32>
      tpu.vector_store %arg7[%c0, %c0_6, %c0_7], %17 {strides = array<i32>} : memref<1x8x128xf32, #tpu.memory_space<vmem>>, vector<1x8x128xf32>,
      %cst_8 = arith.constant 0.000000e+00 : f32
      %18 = vector.broadcast %cst_8 : f32 to vector<8x128xf32>
      %c0_9 = arith.constant 0 : index
      %c0_10 = arith.constant 0 : index
      %c0_11 = arith.constant 0 : index
      %19 = vector.load %arg8[%c0_9, %c0_10, %c0_11] : memref<1x8x128xf32, #tpu.memory_space<vmem>>, vector<1x8x128xf32>
      %20 = vector.shape_cast %19 : vector<1x8x128xf32> to vector<8x128xf32>
      %21 = vector.shape_cast %18 : vector<8x128xf32> to vector<1x8x128xf32>
      tpu.vector_store %arg8[%c0_9, %c0_10, %c0_11], %21 {strides = array<i32>} : memref<1x8x128xf32, #tpu.memory_space<vmem>>, vector<1x8x128xf32>,
    } else {
    }
    %c1_i32 = arith.constant 1 : i32
    %3 = arith.muli %arg0, %c1_i32 : i32
    %4 = arith.addi %3, %arg1 : i32
    %c256_i32 = arith.constant 256 : i32
    %5 = arith.muli %4, %c256_i32 : i32
    %c256_i32_1 = arith.constant 256 : i32
    %6 = arith.addi %5, %c256_i32_1 : i32
    %c12_i32 = arith.constant 12 : i32
    %7 = arith.cmpi sle, %6, %c12_i32 : i32
    %8 = arith.extui %7 : i1 to i32
    %c0_i32_2 = arith.constant 0 : i32
    %9 = arith.cmpi ne, %8, %c0_i32_2 : i32
    scf.if %9 {
      %cst = arith.constant 0.000000e+00 : f32
      %14 = vector.broadcast %cst : f32 to vector<8x128xf32>
      %c0_i32_6 = arith.constant 0 : i32
      %c256_i32_7 = arith.constant 256 : i32
      %15 = arith.muli %c0_i32_6, %c256_i32_7 : i32
      %16 = arith.index_cast %15 : i32 to index
      %c0 = arith.constant 0 : index
      %17 = vector.load %arg4[%16, %c0] : memref<256x128xf32, #tpu.memory_space<vmem>>, vector<256x128xf32>
      %cst_8 = arith.constant 4.000000e-01 : f32
      %18 = vector.broadcast %cst_8 : f32 to vector<256x128xf32>
      %19 = arith.cmpf oge, %17, %18 : vector<256x128xf32>
      %cst_9 = arith.constant 6.000000e-01 : f32
      %20 = vector.broadcast %cst_9 : f32 to vector<256x128xf32>
      %21 = arith.cmpf ole, %17, %20 : vector<256x128xf32>
      %22 = arith.andi %19, %21 : vector<256x128xi1>
      %cst_10 = arith.constant 1.000000e+00 : f32
      %cst_11 = arith.constant 0.000000e+00 : f32
      %23 = vector.broadcast %cst_10 : f32 to vector<256x128xf32>
      %24 = vector.broadcast %cst_11 : f32 to vector<256x128xf32>
      %25 = arith.select %22, %23, %24 : vector<256x128xi1>, vector<256x128xf32>
      %26 = arith.index_cast %15 : i32 to index
      %c0_12 = arith.constant 0 : index
      %27 = vector.load %arg2[%26, %c0_12] : memref<256x128xf32, #tpu.memory_space<vmem>>, vector<256x128xf32>
      %28 = arith.index_cast %15 : i32 to index
      %c0_13 = arith.constant 0 : index
      %29 = vector.load %arg3[%28, %c0_13] : memref<256x128xf32, #tpu.memory_space<vmem>>, vector<256x128xf32>
      %30 = arith.index_cast %15 : i32 to index
      %c0_14 = arith.constant 0 : index
      %31 = vector.load %arg5[%30, %c0_14] : memref<256x128xf32, #tpu.memory_space<vmem>>, vector<256x128xf32>
      %32 = arith.index_cast %15 : i32 to index
      %c0_15 = arith.constant 0 : index
      %33 = vector.load %arg6[%32, %c0_15] : memref<256x128xf32, #tpu.memory_space<vmem>>, vector<256x128xf32>
      %34 = arith.subf %27, %29 : vector<256x128xf32>
      %35 = arith.subf %31, %33 : vector<256x128xf32>
      %36 = arith.mulf %34, %35 : vector<256x128xf32>
      %37 = arith.mulf %36, %36 : vector<256x128xf32>
      %cst_16 = arith.constant 9.99999996E-13 : f32
      %38 = vector.broadcast %cst_16 : f32 to vector<256x128xf32>
      %39 = arith.addf %37, %38 : vector<256x128xf32>
      %40 = math.sqrt %39 : vector<256x128xf32>
      %41 = arith.mulf %40, %25 : vector<256x128xf32>
      %42 = vector.shape_cast %41 : vector<256x128xf32> to vector<32x8x128xf32>
      %cst_17 = arith.constant dense<0.000000e+00> : vector<8x128xf32>
      %43 = vector.multi_reduction <add>, %42, %cst_17 [0] : vector<32x8x128xf32> to vector<8x128xf32>
      %44 = arith.addf %14, %43 : vector<8x128xf32>
      %45 = vector.shape_cast %25 : vector<256x128xf32> to vector<32x8x128xf32>
      %cst_18 = arith.constant dense<0.000000e+00> : vector<8x128xf32>
      %46 = vector.multi_reduction <add>, %45, %cst_18 [0] : vector<32x8x128xf32> to vector<8x128xf32>
      %47 = arith.addf %14, %46 : vector<8x128xf32>
      %c1_i32_19 = arith.constant 1 : i32
      %c0_20 = arith.constant 0 : index
      %c0_21 = arith.constant 0 : index
      %c0_22 = arith.constant 0 : index
      %48 = vector.load %arg7[%c0_20, %c0_21, %c0_22] : memref<1x8x128xf32, #tpu.memory_space<vmem>>, vector<1x8x128xf32>
      %49 = vector.shape_cast %48 : vector<1x8x128xf32> to vector<8x128xf32>
      %50 = arith.addf %49, %44 : vector<8x128xf32>
      %c0_23 = arith.constant 0 : index
      %c0_24 = arith.constant 0 : index
      %c0_25 = arith.constant 0 : index
      %51 = vector.load %arg7[%c0_23, %c0_24, %c0_25] : memref<1x8x128xf32, #tpu.memory_space<vmem>>, vector<1x8x128xf32>
      %52 = vector.shape_cast %51 : vector<1x8x128xf32> to vector<8x128xf32>
      %53 = vector.shape_cast %50 : vector<8x128xf32> to vector<1x8x128xf32>
      tpu.vector_store %arg7[%c0_23, %c0_24, %c0_25], %53 {strides = array<i32>} : memref<1x8x128xf32, #tpu.memory_space<vmem>>, vector<1x8x128xf32>,
      %c0_26 = arith.constant 0 : index
      %c0_27 = arith.constant 0 : index
      %c0_28 = arith.constant 0 : index
      %54 = vector.load %arg8[%c0_26, %c0_27, %c0_28] : memref<1x8x128xf32, #tpu.memory_space<vmem>>, vector<1x8x128xf32>
      %55 = vector.shape_cast %54 : vector<1x8x128xf32> to vector<8x128xf32>
      %56 = arith.addf %55, %47 : vector<8x128xf32>
      %c0_29 = arith.constant 0 : index
      %c0_30 = arith.constant 0 : index
      %c0_31 = arith.constant 0 : index
      %57 = vector.load %arg8[%c0_29, %c0_30, %c0_31] : memref<1x8x128xf32, #tpu.memory_space<vmem>>, vector<1x8x128xf32>
      %58 = vector.shape_cast %57 : vector<1x8x128xf32> to vector<8x128xf32>
      %59 = vector.shape_cast %56 : vector<8x128xf32> to vector<1x8x128xf32>
      tpu.vector_store %arg8[%c0_29, %c0_30, %c0_31], %59 {strides = array<i32>} : memref<1x8x128xf32, #tpu.memory_space<vmem>>, vector<1x8x128xf32>,
    } else {
    }
    %c256_i32_3 = arith.constant 256 : i32
    %10 = arith.addi %5, %c256_i32_3 : i32
    %c12_i32_4 = arith.constant 12 : i32
    %11 = arith.cmpi sgt, %10, %c12_i32_4 : i32
    %12 = arith.extui %11 : i1 to i32
    %c0_i32_5 = arith.constant 0 : i32
    %13 = arith.cmpi ne, %12, %c0_i32_5 : i32
    scf.if %13 {
      %cst = arith.constant 0.000000e+00 : f32
      %14 = vector.broadcast %cst : f32 to vector<8x128xf32>
      %c0_i32_6 = arith.constant 0 : i32
      %c256_i32_7 = arith.constant 256 : i32
      %15 = arith.muli %c0_i32_6, %c256_i32_7 : i32
      %16 = arith.index_cast %15 : i32 to index
      %c0 = arith.constant 0 : index
      %17 = vector.load %arg4[%16, %c0] : memref<256x128xf32, #tpu.memory_space<vmem>>, vector<256x128xf32>
      %cst_8 = arith.constant 4.000000e-01 : f32
      %18 = vector.broadcast %cst_8 : f32 to vector<256x128xf32>
      %19 = arith.cmpf oge, %17, %18 : vector<256x128xf32>
      %cst_9 = arith.constant 6.000000e-01 : f32
      %20 = vector.broadcast %cst_9 : f32 to vector<256x128xf32>
      %21 = arith.cmpf ole, %17, %20 : vector<256x128xf32>
      %22 = arith.andi %19, %21 : vector<256x128xi1>
      %cst_10 = arith.constant 1.000000e+00 : f32
      %cst_11 = arith.constant 0.000000e+00 : f32
      %23 = vector.broadcast %cst_10 : f32 to vector<256x128xf32>
      %24 = vector.broadcast %cst_11 : f32 to vector<256x128xf32>
      %25 = arith.select %22, %23, %24 : vector<256x128xi1>, vector<256x128xf32>
      %26 = arith.index_cast %15 : i32 to index
      %c0_12 = arith.constant 0 : index
      %27 = vector.load %arg2[%26, %c0_12] : memref<256x128xf32, #tpu.memory_space<vmem>>, vector<256x128xf32>
      %28 = arith.index_cast %15 : i32 to index
      %c0_13 = arith.constant 0 : index
      %29 = vector.load %arg3[%28, %c0_13] : memref<256x128xf32, #tpu.memory_space<vmem>>, vector<256x128xf32>
      %30 = arith.index_cast %15 : i32 to index
      %c0_14 = arith.constant 0 : index
      %31 = vector.load %arg5[%30, %c0_14] : memref<256x128xf32, #tpu.memory_space<vmem>>, vector<256x128xf32>
      %32 = arith.index_cast %15 : i32 to index
      %c0_15 = arith.constant 0 : index
      %33 = vector.load %arg6[%32, %c0_15] : memref<256x128xf32, #tpu.memory_space<vmem>>, vector<256x128xf32>
      %34 = arith.subf %27, %29 : vector<256x128xf32>
      %35 = arith.subf %31, %33 : vector<256x128xf32>
      %36 = arith.mulf %34, %35 : vector<256x128xf32>
      %37 = arith.mulf %36, %36 : vector<256x128xf32>
      %cst_16 = arith.constant 9.99999996E-13 : f32
      %38 = vector.broadcast %cst_16 : f32 to vector<256x128xf32>
      %39 = arith.addf %37, %38 : vector<256x128xf32>
      %40 = math.sqrt %39 : vector<256x128xf32>
      %41 = arith.mulf %40, %25 : vector<256x128xf32>
      %42 = arith.addi %5, %15 : i32
      %43 = tpu.iota {dimensions = array<i32: 0>} : vector<256x128xi32>
      %44 = vector.broadcast %42 : i32 to vector<256x128xi32>
      %45 = arith.addi %44, %43 : vector<256x128xi32>
      %c12_i32_17 = arith.constant 12 : i32
      %46 = vector.broadcast %c12_i32_17 : i32 to vector<256x128xi32>
      %47 = arith.cmpi slt, %45, %46 : vector<256x128xi32>
      %cst_18 = arith.constant 0.000000e+00 : f32
      %48 = vector.broadcast %cst_18 : f32 to vector<256x128xf32>
      %49 = arith.select %47, %41, %48 : vector<256x128xi1>, vector<256x128xf32>
      %cst_19 = arith.constant 0.000000e+00 : f32
      %50 = vector.broadcast %cst_19 : f32 to vector<256x128xf32>
      %51 = arith.select %47, %25, %50 : vector<256x128xi1>, vector<256x128xf32>
      %52 = vector.shape_cast %49 : vector<256x128xf32> to vector<32x8x128xf32>
      %cst_20 = arith.constant dense<0.000000e+00> : vector<8x128xf32>
      %53 = vector.multi_reduction <add>, %52, %cst_20 [0] : vector<32x8x128xf32> to vector<8x128xf32>
      %54 = arith.addf %14, %53 : vector<8x128xf32>
      %55 = vector.shape_cast %51 : vector<256x128xf32> to vector<32x8x128xf32>
      %cst_21 = arith.constant dense<0.000000e+00> : vector<8x128xf32>
      %56 = vector.multi_reduction <add>, %55, %cst_21 [0] : vector<32x8x128xf32> to vector<8x128xf32>
      %57 = arith.addf %14, %56 : vector<8x128xf32>
      %c1_i32_22 = arith.constant 1 : i32
      %c0_23 = arith.constant 0 : index
      %c0_24 = arith.constant 0 : index
      %c0_25 = arith.constant 0 : index
      %58 = vector.load %arg7[%c0_23, %c0_24, %c0_25] : memref<1x8x128xf32, #tpu.memory_space<vmem>>, vector<1x8x128xf32>
      %59 = vector.shape_cast %58 : vector<1x8x128xf32> to vector<8x128xf32>
      %60 = arith.addf %59, %54 : vector<8x128xf32>
      %c0_26 = arith.constant 0 : index
      %c0_27 = arith.constant 0 : index
      %c0_28 = arith.constant 0 : index
      %61 = vector.load %arg7[%c0_26, %c0_27, %c0_28] : memref<1x8x128xf32, #tpu.memory_space<vmem>>, vector<1x8x128xf32>
      %62 = vector.shape_cast %61 : vector<1x8x128xf32> to vector<8x128xf32>
      %63 = vector.shape_cast %60 : vector<8x128xf32> to vector<1x8x128xf32>
      tpu.vector_store %arg7[%c0_26, %c0_27, %c0_28], %63 {strides = array<i32>} : memref<1x8x128xf32, #tpu.memory_space<vmem>>, vector<1x8x128xf32>,
      %c0_29 = arith.constant 0 : index
      %c0_30 = arith.constant 0 : index
      %c0_31 = arith.constant 0 : index
      %64 = vector.load %arg8[%c0_29, %c0_30, %c0_31] : memref<1x8x128xf32, #tpu.memory_space<vmem>>, vector<1x8x128xf32>
      %65 = vector.shape_cast %64 : vector<1x8x128xf32> to vector<8x128xf32>
      %66 = arith.addf %65, %57 : vector<8x128xf32>
      %c0_32 = arith.constant 0 : index
      %c0_33 = arith.constant 0 : index
      %c0_34 = arith.constant 0 : index
      %67 = vector.load %arg8[%c0_32, %c0_33, %c0_34] : memref<1x8x128xf32, #tpu.memory_space<vmem>>, vector<1x8x128xf32>
      %68 = vector.shape_cast %67 : vector<1x8x128xf32> to vector<8x128xf32>
      %69 = vector.shape_cast %66 : vector<8x128xf32> to vector<1x8x128xf32>
      tpu.vector_store %arg8[%c0_32, %c0_33, %c0_34], %69 {strides = array<i32>} : memref<1x8x128xf32, #tpu.memory_space<vmem>>, vector<1x8x128xf32>,
    } else {
    }
    return
  }
  func.func @transform_0(%arg0: i32, %arg1: i32) -> (i32, i32) {
    %c0_i32 = arith.constant 0 : i32
    %c0_i32_0 = arith.constant 0 : i32
    return %arg1, %c0_i32 : i32, i32
  }
  func.func @transform_1(%arg0: i32, %arg1: i32) -> (i32, i32) {
    %c0_i32 = arith.constant 0 : i32
    %c0_i32_0 = arith.constant 0 : i32
    return %arg1, %c0_i32 : i32, i32
  }
  func.func @transform_2(%arg0: i32, %arg1: i32) -> (i32, i32) {
    %c0_i32 = arith.constant 0 : i32
    %c0_i32_0 = arith.constant 0 : i32
    return %arg1, %c0_i32 : i32, i32
  }
  func.func @transform_3(%arg0: i32, %arg1: i32) -> (i32, i32) {
    %c0_i32 = arith.constant 0 : i32
    %c0_i32_0 = arith.constant 0 : i32
    return %arg1, %c0_i32 : i32, i32
  }
  func.func @transform_4(%arg0: i32, %arg1: i32) -> (i32, i32) {
    %c0_i32 = arith.constant 0 : i32
    %c0_i32_0 = arith.constant 0 : i32
    return %arg1, %c0_i32 : i32, i32
  }
  func.func @transform_5(%arg0: i32, %arg1: i32) -> (i32, i32, i32) {
    %c0_i32 = arith.constant 0 : i32
    %c0_i32_0 = arith.constant 0 : i32
    %c0_i32_1 = arith.constant 0 : i32
    return %arg0, %c0_i32, %c0_i32_0 : i32, i32, i32
  }
  func.func @transform_6(%arg0: i32, %arg1: i32) -> (i32, i32, i32) {
    %c0_i32 = arith.constant 0 : i32
    %c0_i32_0 = arith.constant 0 : i32
    %c0_i32_1 = arith.constant 0 : i32
    return %arg0, %c0_i32, %c0_i32_0 : i32, i32, i32
  }
}

</mosaic_0001>

<bundles_post_ra>
// kernel: comp_loss.1
= control target key start
LH: loop header
LB: loop body
LE: loop exit
PB: predicated region body
PF: predicated region fallthrough
CT: control target
= control target key end

     0   :  { %v1517_v0 = vlaneseq  ;;  %v1762_v18 = vmov 0.0   ;;  %s1842_s0 = inlined_call_operand.vmem [shape: f32[12,128], index: 0, kind: input, shape index: {}]   ;;  %s1843_s1 = inlined_call_operand.vmem [shape: f32[12,128], index: 1, kind: input, shape index: {}]   ;;  %s1844_s2 = inlined_call_operand.vmem [shape: f32[12,128], index: 2, kind: input, shape index: {}]   ;;  %s1845_s3 = inlined_call_operand.vmem [shape: f32[12,128], index: 3, kind: input, shape index: {}]   ;;  %s1846_s4 = inlined_call_operand.vmem [shape: f32[12,128], index: 4, kind: input, shape index: {}]   ;;  %s1847_s6 = inlined_call_operand.vmem [shape: f32[1,8,128], index: 6, kind: output, shape index: {1}]   ;;  %s1848_s5 = inlined_call_operand.vmem [shape: f32[1,8,128], index: 5, kind: output, shape index: {0}]  }
   0x1   :  { %v813_v1 = vld [vmem:[%s1844_s2] sm:$0xff]  ;;  %v814_v2 = vld [vmem:[%s1844_s2 + $0x8] sm:$0xff] }
   0x2   :  { %v974_v3 = vld [vmem:[%s1842_s0 + $0x8] sm:$0xff]  ;;  %vm845_vm0 = vcmp.ge.f32.partialorder %v813_v1, 0.4  ;;  %vm846_vm1 = vcmp.ge.f32.partialorder %v814_v2, 0.4  ;;  %v1518_v7 = vshrl.u32 %v1517_v0, 7 }
   0x3   :  { %vm877_vm2 = vcmp.le.f32.partialorder %v813_v1, 0.6  ;;  %vm878_vm3 = vcmp.le.f32.partialorder %v814_v2, 0.6  ;;  %v1006_v5 = vld [vmem:[%s1843_s1 + $0x8] sm:$0xff]  ;;  %v973_v10 = vld [vmem:[%s1842_s0] sm:$0xff] }
   0x4   :  { %vm1807_vm4 = vmand %vm845_vm0, %vm877_vm2  ;;  %v1038_v6 = vld [vmem:[%s1845_s3 + $0x8] sm:$0xff]  ;;  %v1102_v9 = vsub.f32 %v974_v3, %v1006_v5  ;;  %v1005_v12 = vld [vmem:[%s1843_s1] sm:$0xff]  ;;  %v1519_v15 = vadd.s32 8, %v1518_v7 }
   0x5   :  { %vm910_vm5 = vmand %vm846_vm1, %vm878_vm3  ;;  %v1070_v8 = vld [vmem:[%s1846_s4 + $0x8] sm:$0xff]  ;;  %v1037_v13 = vld [vmem:[%s1845_s3] sm:$0xff]  ;;  %v1101_v16 = vsub.f32 %v973_v10, %v1005_v12  ;;  %v941_v21 = vsel %vm1807_vm4, 1.0, %v1762_v18 }
   0x6   :  { %v1134_v11 = vsub.f32 %v1038_v6, %v1070_v8  ;;  %v1069_v14 = vld [vmem:[%s1846_s4] sm:$0xff]  ;;  %v942_v19 = vsel %vm910_vm5, 1.0, %v1762_v18  ;;  %vm1584_vm6 = vcmp.lt.s32.totalorder %v1519_v15, 12 }
   0x7   :  { %v1133_v17 = vsub.f32 %v1037_v13, %v1069_v14  ;;  %v1648_v23 = vsel %vm1584_vm6, %v942_v19, 0.0 }
   0x8   :  { %v1166_v20 = vmul.f32 %v1134_v11, %v1102_v9  ;;  %v1711_v25 = vadd.f32 %v1648_v23, %v941_v21 }
   0x9   :  { %v1165_v22 = vmul.f32 %v1133_v17, %v1101_v16 }
   0xa   :  { %v1198_v24 = vmul.f32 %v1166_v20, %v1166_v20  ;;  %1748 = vst [vmem:[%s1847_s6] sm:$0xff] %v1711_v25 }
   0xb   :  { %v1197_v26 = vmul.f32 %v1165_v22, %v1165_v22 }
   0xc   :  { %v1230_v27 = vadd.f32 1e-12, %v1198_v24 }
   0xd   :  { %v1229_v28 = vadd.f32 1e-12, %v1197_v26 }
   0xe   :  { %1758 = vrsqrt.f32 %v1230_v27  ;;  %vm1270_vm7 = vcmp.eq.f32.partialorder %v1230_v27, inf  ;;  %v1273_v30 = vand.u32 2147483648, %v1230_v27  ;;  %vm1272_vm8 = vcmp.eq.f32.partialorder %v1230_v27, 0.0 }
   0xf   :  { %1760 = vrsqrt.f32 %v1229_v28  ;;  %vm1263_vm9 = vcmp.eq.f32.partialorder %v1229_v28, inf  ;;  %v1266_v33 = vand.u32 2147483648, %v1229_v28  ;;  %vm1265_vm10 = vcmp.eq.f32.partialorder %v1229_v28, 0.0 }
  0x1b   :  { %v1759_v29 = vpop.eup %1758 }
  0x1c   :  { %v1761_v31 = vpop.eup %1760  ;;  %v1269_v32 = vmul.f32 %v1759_v29, %v1230_v27 }
  0x1d   :  { %v1262_v34 = vmul.f32 %v1761_v31, %v1229_v28 }
  0x1e   :  { %v1271_v35 = vsel %vm1270_vm7, %v1230_v27, %v1269_v32 }
  0x1f   :  { %v1274_v36 = vsel %vm1272_vm8, %v1273_v30, %v1271_v35  ;;  %v1264_v37 = vsel %vm1263_vm9, %v1229_v28, %v1262_v34 }
  0x20   :  { %v1486_v38 = vmul.f32 %v1274_v36, %v942_v19  ;;  %v1267_v39 = vsel %vm1265_vm10, %v1266_v33, %v1264_v37 }
  0x21   :  { %v1485_v40 = vmul.f32 %v1267_v39, %v941_v21 }
  0x22   :  { %v1616_v41 = vsel %vm1584_vm6, %v1486_v38, 0.0 }
  0x23   :  { %v1679_v42 = vadd.f32 %v1616_v41, %v1485_v40 }
  0x25   :  { %1745 = vst [vmem:[%s1848_s5] sm:$0xff] %v1679_v42 }

</bundles_post_ra>
